<compile_context>
chip_gen: v7x
topology: tpu7x:2x2x1
jax: 0.10.0
libtpu: 0.0.40
codegen_flags: <defaults>
</compile_context>

<pallas_src>
import functools

import jax
import jax.numpy as jnp
from jax.experimental import pallas as pl
from jax.experimental.pallas import tpu as pltpu


def _round_up(x, m):
    return ((x + m - 1) // m) * m


def _vmem_budgets():
    """Generation-aware per-buffer budget and explicit scoped-VMEM limit."""
    try:
        vmem_phys = int(pltpu.get_tpu_info().vmem_capacity_bytes)
    except Exception:
        vmem_phys = 64 * 1024 * 1024        # conservative: v7x per-TensorCore VMEM
    # Double-buffered x -> 2 * per_buf; keep per_buf ~ 1/8 of physical VMEM.
    per_buf = min(16 * 1024 * 1024, max(2 * 1024 * 1024, vmem_phys // 8))
    # Explicit limit with headroom for weights/output/internal scratch, never
    # above half of physical VMEM (v5e/v6e -> 64 MiB, v7x -> 32 MiB).
    vmem_limit = min(64 * 1024 * 1024,
                     max(2 * per_buf + 8 * 1024 * 1024, vmem_phys // 2))
    vmem_limit = min(vmem_limit, vmem_phys)
    return per_buf, vmem_limit


def _choose_tiles(num_rows, hw, elem_bytes, per_buf_bytes):
    """Pick (tile_r, tile_hw) for x viewed as (num_rows, hw)."""
    budget = max(per_buf_bytes // elem_bytes, 8 * 128)   # elements per buffer

    # Whole input in one block: grid (1, 1), no reduction carry, no mask.
    if num_rows * hw <= budget:
        return num_rows, hw

    # Single spatial step per row tile (tile_hw = full HW): as many row groups
    # of 8 as fit the budget -> fully contiguous multi-MiB DMAs.
    if 8 * hw <= budget:
        tile_r = (budget // hw) // 8 * 8
        if tile_r >= num_rows:
            tile_r = num_rows
        return tile_r, hw

    # Multi-step spatial reduction: minimal legal row tile, lanes in multiples
    # of 128 sized to the budget.
    tile_r = 8 if num_rows >= 8 else num_rows
    tile_hw = max(128, (budget // tile_r) // 128 * 128)
    if tile_hw >= hw:
        tile_hw = hw
    return tile_r, tile_hw


def _se_pool_kernel(x_ref, o_ref, acc_ref, *, hw, tile_hw, needs_mask):
    # x_ref:   (tile_r, tile_hw) native dtype
    # o_ref:   (tile_r, 1) f32   (pooled mean per row, written on last step)
    # acc_ref: (tile_r, 1) f32 scratch, resident across the spatial grid axis.
    k = pl.program_id(1)
    nk = pl.num_programs(1)

    @pl.when(k == 0)
    def _init():
        acc_ref[...] = jnp.zeros_like(acc_ref)

    # Upcast in-kernel so x travels over HBM in its native (possibly bf16) dtype.
    x = x_ref[...].astype(jnp.float32)

    if needs_mask:
        # Only the last spatial tile overhangs HW; full tiles skip the mask.
        @pl.when(k < nk - 1)
        def _full_tile():
            acc_ref[...] += jnp.sum(x, axis=-1, keepdims=True)

        @pl.when(k == nk - 1)
        def _partial_tile():
            lane = jax.lax.broadcasted_iota(jnp.int32, x.shape, dimension=1)
            xm = jnp.where(lane < (hw - k * tile_hw), x, 0.0)
            acc_ref[...] += jnp.sum(xm, axis=-1, keepdims=True)
    else:
        acc_ref[...] += jnp.sum(x, axis=-1, keepdims=True)

    @pl.when(k == nk - 1)
    def _finalize():
        o_ref[...] = (acc_ref[...] * (1.0 / hw)).astype(o_ref.dtype)


def _se_excite_kernel(pooled_ref, w1_ref, b1_ref, w2_ref, b2_ref, o_ref):
    # pooled_ref: (B, C) f32, w1: (C, Cr), b1: (1, Cr), w2: (Cr, C), b2: (1, C)
    h = jnp.dot(pooled_ref[...], w1_ref[...],
                preferred_element_type=jnp.float32) + b1_ref[...]
    h = jnp.maximum(h, 0.0)
    y = jnp.dot(h, w2_ref[...],
                preferred_element_type=jnp.float32) + b2_ref[...]
    o_ref[...] = jax.nn.sigmoid(y).astype(o_ref.dtype)


def se_forward(x_nchw, w_compress, b_compress, w_excite, b_excite,
               *, tile_r=None, tile_hw=None):
    """x_nchw: (B, C, H, W).  PyTorch Conv2d 1x1 weight layout:
       w_compress: (Cr, C, 1, 1), b_compress: (Cr,)
       w_excite:   (C, Cr, 1, 1), b_excite:   (C,)
       Returns sigmoid(excite(relu(compress(avgpool(x))))) of shape (B, C, 1, 1)."""
    B, C, H, W = x_nchw.shape
    Cr = w_compress.shape[0]
    HW = H * W
    R = B * C

    x_rows = x_nchw.reshape(R, HW)            # native dtype on the wire

    per_buf_bytes, vmem_limit_bytes = _vmem_budgets()
    auto_r, auto_hw = _choose_tiles(R, HW, x_rows.dtype.itemsize, per_buf_bytes)
    tile_r = auto_r if tile_r is None else int(tile_r)
    tile_hw = auto_hw if tile_hw is None else int(tile_hw)

    grid = (pl.cdiv(R, tile_r), pl.cdiv(HW, tile_hw))
    needs_mask = (HW % tile_hw) != 0

    pool_kernel = functools.partial(
        _se_pool_kernel, hw=HW, tile_hw=tile_hw, needs_mask=needs_mask)

    pooled = pl.pallas_call(
        pool_kernel,
        out_shape=jax.ShapeDtypeStruct((R, 1), jnp.float32),
        grid_spec=pltpu.PrefetchScalarGridSpec(
            num_scalar_prefetch=0,
            grid=grid,                              # (row tiles, spatial reduce)
            in_specs=[pl.BlockSpec((tile_r, tile_hw), lambda r, k: (r, k))],
            out_specs=pl.BlockSpec((tile_r, 1), lambda r, k: (r, 0)),
            scratch_shapes=[pltpu.VMEM((tile_r, 1), jnp.float32)],
        ),
        compiler_params=pltpu.CompilerParams(
            dimension_semantics=("parallel", "arbitrary"),
            vmem_limit_bytes=int(vmem_limit_bytes)),
        cost_estimate=pl.CostEstimate(
            flops=R * HW,
            transcendentals=0,
            bytes_accessed=R * HW * x_rows.dtype.itemsize + R * 4),
    )(x_rows)

    # Tiny batched epilogue: two 1x1 convs (matmuls) + bias + sigmoid over (B, C).
    pooled_bc = pooled.reshape(B, C)
    w1 = w_compress.reshape(Cr, C).T.astype(jnp.float32)     # (C, Cr)
    b1 = b_compress.reshape(1, Cr).astype(jnp.float32)
    w2 = w_excite.reshape(C, Cr).T.astype(jnp.float32)       # (Cr, C)
    b2 = b_excite.reshape(1, C).astype(jnp.float32)

    gate = pl.pallas_call(
        _se_excite_kernel,
        out_shape=jax.ShapeDtypeStruct((B, C), x_nchw.dtype),
        cost_estimate=pl.CostEstimate(
            flops=4 * B * C * Cr + 6 * B * C,
            transcendentals=B * C,
            bytes_accessed=4 * (2 * B * C + 2 * C * Cr + Cr + C)),
    )(pooled_bc, w1, b1, w2, b2)

    return gate.reshape(B, C, 1, 1)


def se_reference(x_nchw, w_compress, b_compress, w_excite, b_excite):
    """Plain-JAX reference mirroring the PyTorch forward."""
    pooled = jnp.mean(x_nchw.astype(jnp.float32), axis=(2, 3))     # (B, C)
    Cr, C = w_compress.shape[0], w_compress.shape[1]
    h = pooled @ w_compress.reshape(Cr, C).T + b_compress
    h = jnp.maximum(h, 0.0)
    y = h @ w_excite.reshape(C, Cr).T + b_excite
    return jax.nn.sigmoid(y)[:, :, None, None].astype(x_nchw.dtype)


if __name__ == "__main__":
    # SE(in_chnls=16, ratio=4)
    B, C, H, W = 2, 16, 16, 16
    ratio = 4
    Cr = C // ratio

    key = jax.random.PRNGKey(0)
    kx, kw1, kb1, kw2, kb2 = jax.random.split(key, 5)

    x = jax.random.normal(kx, (B, C, H, W), dtype=jnp.float32)
    # Deterministic synthetic parameters (PyTorch Conv2d weight layout, 1x1 kernels).
    w_compress = jax.random.normal(kw1, (Cr, C, 1, 1), dtype=jnp.float32) * 0.1
    b_compress = jax.random.normal(kb1, (Cr,), dtype=jnp.float32) * 0.1
    w_excite = jax.random.normal(kw2, (C, Cr, 1, 1), dtype=jnp.float32) * 0.1
    b_excite = jax.random.normal(kb2, (C,), dtype=jnp.float32) * 0.1

    def check(out, ref, name):
        assert out.shape == ref.shape, name
        assert jnp.allclose(out, ref, atol=1e-5, rtol=1e-5), f"mismatch: {name}"

    # 1) Auto-tiled fast path: whole x fits one block -> grid (1, 1), no mask.
    ref = se_reference(x, w_compress, b_compress, w_excite, b_excite)
    out = jax.block_until_ready(
        se_forward(x, w_compress, b_compress, w_excite, b_excite))
    check(out, ref, "auto fast path")

    # 2) Masked multi-step spatial reduction: HW = 15*13 = 195 with tile_hw=128
    #    -> 2 reduction steps, mask applied on the last tile only.
    x2 = jax.random.normal(kx, (B, C, 15, 13), dtype=jnp.float32)
    ref2 = se_reference(x2, w_compress, b_compress, w_excite, b_excite)
    out2 = jax.block_until_ready(
        se_forward(x2, w_compress, b_compress, w_excite, b_excite, tile_hw=128))
    check(out2, ref2, "masked spatial reduction")

    # 3) Row-parallel path for B == 1 (channels split across row tiles, the
    #    layout that keeps both v7x TensorCores busy): R = 16 rows, tile_r = 8.
    x3 = jax.random.normal(kx, (1, C, 9, 9), dtype=jnp.float32)
    ref3 = se_reference(x3, w_compress, b_compress, w_excite, b_excite)
    out3 = jax.block_until_ready(
        se_forward(x3, w_compress, b_compress, w_excite, b_excite, tile_r=8))
    check(out3, ref3, "row-parallel B=1")

    # 4) Partial row tile: R = 32 rows with tile_r = 24 -> last row block padded.
    out4 = jax.block_until_ready(
        se_forward(x, w_compress, b_compress, w_excite, b_excite, tile_r=24))
    check(out4, ref, "partial row tile")

    print("KERNEL_OK")
</pallas_src>

<mosaic_0001>
module attributes {stable_mosaic.version = 11 : i64} {
  func.func @_se_pool_kernel(%arg0: i32, %arg1: i32, %arg2: memref<32x256xf32, #tpu.memory_space<vmem>>, %arg3: memref<32x1xf32, #tpu.memory_space<vmem>>, %arg4: memref<32x1xf32, #tpu.memory_space<vmem>>) attributes {dimension_semantics = [#tpu.dimension_semantics<parallel>, #tpu.dimension_semantics<arbitrary>], iteration_bounds = array<i64: 1, 1>, scalar_prefetch = 0 : i64, scratch_operands = 1 : i64, tpu.core_type = #tpu.core_type<tc>, window_params = [{transform_indices = @transform_0, window_bounds = array<i64: 32, 256>}, {transform_indices = @transform_1, window_bounds = array<i64: 32, 1>}]} {
    %c0_i32 = arith.constant 0 : i32
    %0 = arith.cmpi eq, %arg1, %c0_i32 : i32
    %1 = arith.extui %0 : i1 to i32
    %c0_i32_0 = arith.constant 0 : i32
    %2 = arith.cmpi ne, %1, %c0_i32_0 : i32
    scf.if %2 {
      %cst_8 = arith.constant 0.000000e+00 : f32
      %12 = vector.broadcast %cst_8 : f32 to vector<32x1xf32>
      %c0_9 = arith.constant 0 : index
      %c0_10 = arith.constant 0 : index
      %13 = vector.load %arg4[%c0_9, %c0_10] : memref<32x1xf32, #tpu.memory_space<vmem>>, vector<32x1xf32>
      tpu.vector_store %arg4[%c0_9, %c0_10], %12 {strides = array<i32>} : memref<32x1xf32, #tpu.memory_space<vmem>>, vector<32x1xf32>,
    } else {
    }
    %c0 = arith.constant 0 : index
    %c0_1 = arith.constant 0 : index
    %3 = vector.load %arg2[%c0, %c0_1] : memref<32x256xf32, #tpu.memory_space<vmem>>, vector<32x256xf32>
    %c0_2 = arith.constant 0 : index
    %c0_3 = arith.constant 0 : index
    %4 = vector.load %arg4[%c0_2, %c0_3] : memref<32x1xf32, #tpu.memory_space<vmem>>, vector<32x1xf32>
    %cst = arith.constant dense<0.000000e+00> : vector<32xf32>
    %5 = vector.multi_reduction <add>, %3, %cst [1] : vector<32x256xf32> to vector<32xf32>
    %6 = vector.shape_cast %5 : vector<32xf32> to vector<32x1xf32>
    %7 = arith.addf %4, %6 : vector<32x1xf32>
    %c0_4 = arith.constant 0 : index
    %c0_5 = arith.constant 0 : index
    %8 = vector.load %arg4[%c0_4, %c0_5] : memref<32x1xf32, #tpu.memory_space<vmem>>, vector<32x1xf32>
    tpu.vector_store %arg4[%c0_4, %c0_5], %7 {strides = array<i32>} : memref<32x1xf32, #tpu.memory_space<vmem>>, vector<32x1xf32>,
    %c0_i32_6 = arith.constant 0 : i32
    %9 = arith.cmpi eq, %arg1, %c0_i32_6 : i32
    %10 = arith.extui %9 : i1 to i32
    %c0_i32_7 = arith.constant 0 : i32
    %11 = arith.cmpi ne, %10, %c0_i32_7 : i32
    scf.if %11 {
      %c0_8 = arith.constant 0 : index
      %c0_9 = arith.constant 0 : index
      %12 = vector.load %arg4[%c0_8, %c0_9] : memref<32x1xf32, #tpu.memory_space<vmem>>, vector<32x1xf32>
      %cst_10 = arith.constant 3.906250e-03 : f32
      %13 = vector.broadcast %cst_10 : f32 to vector<32x1xf32>
      %14 = arith.mulf %12, %13 : vector<32x1xf32>
      %c0_11 = arith.constant 0 : index
      %c0_12 = arith.constant 0 : index
      %15 = vector.load %arg3[%c0_11, %c0_12] : memref<32x1xf32, #tpu.memory_space<vmem>>, vector<32x1xf32>
      tpu.vector_store %arg3[%c0_11, %c0_12], %14 {strides = array<i32>} : memref<32x1xf32, #tpu.memory_space<vmem>>, vector<32x1xf32>,
    } else {
    }
    return
  }
  func.func @transform_0(%arg0: i32, %arg1: i32) -> (i32, i32) {
    %c0_i32 = arith.constant 0 : i32
    return %arg0, %arg1 : i32, i32
  }
  func.func @transform_1(%arg0: i32, %arg1: i32) -> (i32, i32) {
    %c0_i32 = arith.constant 0 : i32
    %c0_i32_0 = arith.constant 0 : i32
    return %arg0, %c0_i32 : i32, i32
  }
}

</mosaic_0001>

<bundles_post_ra>
// kernel: tpu_custom_call.1
= control target key start
LH: loop header
LB: loop body
LE: loop exit
PB: predicated region body
PF: predicated region fallthrough
CT: control target
= control target key end

     0   :  { %6 = vsyncpa [#allocation4], 0  ;;  %s112_s6 = smov [#allocation3]   ;;  %s162_s0 = inlined_call_operand.hbm [shape: f32[32,256], index: 0, kind: input, shape index: {}]   ;;  %s163_s1 = inlined_call_operand.vmem [shape: f32[32,1], index: 1, kind: output, shape index: {}]  }
   0x1   :  { %s12_s7 = sshll.u32 %s112_s6, 4  ;;  %s88_s10 = scalar_lea.hbm %s162_s0, 1024  ;;  %s13_s7 = int_to_ptr.vmem [resolvable:$true] %s12_s7 }
   0x2   :  { %p89_p0 = scmp.ne.s32.totalorder %s162_s0, %s88_s10  ;;  %p92_p1 = scmp.lt.u32.totalorder %s88_s10, %s162_s0 }
   0x4   :  { %p94_p2 = pnand %p92_p1, %p89_p0 }
   0x6   :  { %97 = shalt.err (!%p94_p2)
}
   0x7   :  { %s98_s15 = scalar_lea.vmem %s13_s7, 1024  ;;  %p103_p4 = scmp.lt.s32.totalorder %s13_s7, %s13_s7 }
   0x8   :  { %p99_p3 = scmp.ne.s32.totalorder %s13_s7, %s98_s15  ;;  %p104_p5 = scmp.lt.s32.totalorder %s98_s15, %s98_s15 }
   0xa   :  { %p105_p6 = por %p104_p5, %p103_p4 }
   0xc   :  { %p106_p7 = pnand %p105_p6, %p99_p3 }
   0xe   :  { %109 = shalt.err (!%p106_p7)
}
   0xf   :  { %s113_s16 = smov 256   ;;  %s114_s17 = smov 16  }
  0x10   :  { %18 = dma.hbm_to_vmem [thread:$0]  %s162_s0, 1024, %s13_s7, [#allocation4], %s113_s16, %s113_s16, %s114_s17  }
  0x11   :  { %110 = dma.done.wait [#allocation4], 1024  }
  0x12   :  { %111 = vsyncadd [#allocation4], 4294966272  ;;  %vm26_vm0 = vcmask 7168   ;;  %v115_v0 = vmov 0.0   ;;  %v35_v1 = vld [vmem:[#allocation3 + $0x20] sm:$0xff]  ;;  %v36_v2 = vld [vmem:[#allocation3 + $0x28] sm:$0xff] }
  0x13   :  { %29 = vst.msk [vmem:[#allocation2 + $0x10] sm:$0xff] %vm26_vm0, %v115_v0  ;;  %27 = vst.msk [vmem:[#allocation2] sm:$0xff] %vm26_vm0, %v115_v0  ;;  %v31_v3 = vld [vmem:[#allocation3] sm:$0xff]  ;;  %v49_v4 = vadd.f32 %v36_v2, %v35_v1  ;;  %v32_v5 = vld [vmem:[#allocation3 + $0x8] sm:$0xff] }
  0x14   :  { %28 = vst.msk [vmem:[#allocation2 + $0x8] sm:$0xff] %vm26_vm0, %v115_v0  ;;  %30 = vst.msk [vmem:[#allocation2 + $0x18] sm:$0xff] %vm26_vm0, %v115_v0  ;;  %v37_v6 = vld [vmem:[#allocation3 + $0x30] sm:$0xff]  ;;  %v38_v7 = vld [vmem:[#allocation3 + $0x38] sm:$0xff]  ;;  %v43_v8 = vadd.f32 %v32_v5, %v31_v3 }
  0x15   :  { %v33_v9 = vld [vmem:[#allocation3 + $0x10] sm:$0xff]  ;;  %v34_v10 = vld [vmem:[#allocation3 + $0x18] sm:$0xff]  ;;  %50 = vadd.xlane.f32.xlu1 %v49_v4  ;;  %v52_v11 = vadd.f32 %v38_v7, %v37_v6 }
  0x16   :  { %44 = vadd.xlane.f32.xlu0 %v43_v8  ;;  %v46_v12 = vadd.f32 %v34_v10, %v33_v9 }
  0x19   :  { %53 = vadd.xlane.f32.xlu1 %v52_v11 }
  0x1a   :  { %47 = vadd.xlane.f32.xlu0 %v46_v12  ;;  %v41_v13 = vld [vmem:[#allocation2 + $0x10] sm:$0xff]  ;;  %v39_v14 = vld [vmem:[#allocation2] sm:$0xff] }
  0x1b   :  { %v42_v19 = vld [vmem:[#allocation2 + $0x18] sm:$0xff]  ;;  %v40_v20 = vld [vmem:[#allocation2 + $0x8] sm:$0xff] }
  0xa2   :  { %v51_v15 = vpop.xlane.xlu1 %50 }
  0xa3   :  { %v57_v16 = vadd.f32 %v51_v15, %v41_v13  ;;  %v45_v17 = vpop.xlane.xlu0 %44 }
  0xa4   :  { %v55_v18 = vadd.f32 %v45_v17, %v39_v14 }
  0xa5   :  { %62 = vst.msk [vmem:[#allocation2 + $0x10] sm:$0xff] %vm26_vm0, %v57_v16 }
  0xa6   :  { %60 = vst.msk [vmem:[#allocation2] sm:$0xff] %vm26_vm0, %v55_v18  ;;  %v54_v21 = vpop.xlane.xlu1 %53 }
  0xa7   :  { %v58_v22 = vadd.f32 %v54_v21, %v42_v19  ;;  %v48_v23 = vpop.xlane.xlu0 %47 }
  0xa8   :  { %v56_v24 = vadd.f32 %v48_v23, %v40_v20 }
  0xa9   :  { %63 = vst.msk [vmem:[#allocation2 + $0x18] sm:$0xff] %vm26_vm0, %v58_v22 }
  0xaa   :  { %61 = vst.msk [vmem:[#allocation2 + $0x8] sm:$0xff] %vm26_vm0, %v56_v24 }
  0xac   :  { %v69_v25 = vld [vmem:[#allocation2 + $0x10] sm:$0xff] }
  0xad   :  { %v73_v26 = vmul.f32 0.00390625, %v69_v25  ;;  %v67_v27 = vld [vmem:[#allocation2] sm:$0xff] }
  0xae   :  { %v71_v28 = vmul.f32 0.00390625, %v67_v27 }
  0xaf   :  { %77 = vst.msk [vmem:[%s163_s1 + $0x10] sm:$0xff] %vm26_vm0, %v73_v26 }
  0xb0   :  { %75 = vst.msk [vmem:[%s163_s1] sm:$0xff] %vm26_vm0, %v71_v28  ;;  %v70_v29 = vld [vmem:[#allocation2 + $0x18] sm:$0xff] }
  0xb1   :  { %v74_v30 = vmul.f32 0.00390625, %v70_v29  ;;  %v68_v31 = vld [vmem:[#allocation2 + $0x8] sm:$0xff] }
  0xb2   :  { %v72_v32 = vmul.f32 0.00390625, %v68_v31 }
  0xb3   :  { %78 = vst.msk [vmem:[%s163_s1 + $0x18] sm:$0xff] %vm26_vm0, %v74_v30 }
  0xb4   :  { %76 = vst.msk [vmem:[%s163_s1 + $0x8] sm:$0xff] %vm26_vm0, %v72_v32 }
  0xb5   :  { %83 = vsyncpa [#allocation4], 1 }

</bundles_post_ra>
